<compile_context>
chip_gen: v7x
topology: tpu7x:2x2x1
jax: 0.10.0
libtpu: 0.0.40
codegen_flags: <defaults>
</compile_context>

<pallas_src>
import functools

import jax
import jax.numpy as jnp
from jax import lax
from jax.experimental import pallas as pl
from jax.experimental.pallas import tpu as pltpu


def _cdiv(a, b):
    return -(-a // b)


def _vmem_capacity_bytes():
    """Physical VMEM per core (v5e/v6e: 128 MiB, v7x: 64 MiB), with a safe fallback."""
    try:
        info = pltpu.get_tpu_info()
        cap = getattr(info, "vmem_capacity_bytes", None)
        if cap:
            return int(cap)
    except Exception:
        pass
    return 64 * 1024 * 1024  # conservative (v7x-sized) fallback


_ROW_TILE_CANDIDATES = (1024, 512, 256, 128, 64, 32, 16, 8)


def _choose_tiles(B, S, V, itemsize, sub, vmem_cap):
    """Pick (seq_tile, vocab_tile) from the VMEM capacity and input dtype."""
    # Vocab tile: full vocab when modest; otherwise the largest lane-aligned
    # chunk <= 2048 that divides V (keeps the hot loop mask-free).
    if V <= 4096:
        tv = V
    else:
        tv = 2048
        for cand in (2048, 1536, 1024, 768, 512, 384, 256, 128):
            if V % cand == 0:
                tv = cand
                break
    # Row tile: biggest candidate whose per-step working set -- double-buffered
    # raw logits plus ~3 full-block f32 temporaries -- fits ~40% of VMEM.
    budget = int(vmem_cap * 0.40)
    per_row = tv * (2 * itemsize + 3 * 4)
    max_rows = max(sub, budget // per_row)
    if S <= max_rows:
        ts = S  # full-extent block is always legal
    else:
        ts = sub
        for cand in _ROW_TILE_CANDIDATES:
            if cand <= max_rows and cand % sub == 0:
                ts = cand
                break
    # Megacore: for B == 1 keep at least two seq tiles so both TCs get work.
    if B == 1 and ts >= S:
        half = _cdiv(S, 2)
        half = _cdiv(half, sub) * sub
        if half < S:
            ts = half
    return ts, tv


def _lse_kernel(logits_ref, lse_ref, m_sc, l_sc, *, vocab_size, ragged):
    """Streaming logsumexp over vocab tiles for one (batch, seq-tile) block."""
    k = pl.program_id(2)  # vocab-tile index (innermost, "arbitrary")

    @pl.when(k == 0)
    def _():
        m_sc[...] = jnp.full_like(m_sc, -jnp.inf)
        l_sc[...] = jnp.zeros_like(l_sc)

    x = logits_ref[...].astype(jnp.float32)  # (1, ts, tv)
    tv = x.shape[-1]

    if ragged:
        # Only a statically-ragged vocab tiling pays for a mask; it uses a
        # lane-only (1, 1, tv) iota broadcast against the remaining-vocab count.
        lane = lax.broadcasted_iota(jnp.int32, (1, 1, tv), 2)
        x = jnp.where(lane < (vocab_size - k * tv), x, -jnp.inf)

    # Online (streaming) logsumexp across vocab blocks.
    m_prev = m_sc[...]
    m_new = jnp.maximum(m_prev, jnp.max(x, axis=-1, keepdims=True))
    l_sc[...] = (l_sc[...] * jnp.exp(m_prev - m_new)
                 + jnp.sum(jnp.exp(x - m_new), axis=-1, keepdims=True))
    m_sc[...] = m_new

    @pl.when(k == pl.num_programs(2) - 1)
    def _():
        lse_ref[...] = m_sc[...] + jnp.log(l_sc[...])


def shifted_cross_entropy(logits, labels, *, ignore_index=-100,
                          tile_rows=None, tile_vocab=None):
    """Equivalent of LossWrapper.forward: mean CE over shifted, non-ignored tokens."""
    B, S, V = logits.shape
    itemsize = jnp.dtype(logits.dtype).itemsize
    sub = {4: 8, 2: 16, 1: 32}.get(itemsize, 8)  # dtype-aware sublane granularity
    cap = _vmem_capacity_bytes()

    auto_ts, auto_tv = _choose_tiles(B, S, V, itemsize, sub, cap)
    ts = tile_rows if tile_rows is not None else auto_ts
    tv = tile_vocab if tile_vocab is not None else auto_tv
    assert ts == S or ts % sub == 0, (
        f"row tile must be a multiple of {sub} (dtype sublane) or the full seq")
    assert tv == V or tv % 128 == 0, "vocab tile must be a multiple of 128 or full V"
    ragged = (V % tv) != 0  # static: aligned tilings never build the mask

    grid = (B, _cdiv(S, ts), _cdiv(V, tv))
    # Generation-aware scoped-VMEM limit (v7x: 64 MiB physical, v5e/v6e: 128 MiB).
    vmem_limit = int(min(cap * 0.8, 100 * 1024 * 1024))

    kernel = functools.partial(_lse_kernel, vocab_size=V, ragged=ragged)

    # NOTE: pipeline_mode=pl.Buffered(3) on the logits BlockSpec is an optional
    # knob worth re-measuring on v7x after tile shrinking; left at the default
    # depth-2 here for robustness.
    lse = pl.pallas_call(
        kernel,
        out_shape=jax.ShapeDtypeStruct((B, S, 1), jnp.float32),
        grid_spec=pltpu.PrefetchScalarGridSpec(
            num_scalar_prefetch=0,
            grid=grid,
            in_specs=[pl.BlockSpec((1, ts, tv), lambda b, t, k: (b, t, k))],
            out_specs=pl.BlockSpec((1, ts, 1), lambda b, t, k: (b, t, 0)),
            scratch_shapes=[
                pltpu.VMEM((1, ts, 1), jnp.float32),  # running max
                pltpu.VMEM((1, ts, 1), jnp.float32),  # running sum-exp
            ],
        ),
        compiler_params=pltpu.CompilerParams(
            dimension_semantics=("parallel", "parallel", "arbitrary"),
            vmem_limit_bytes=vmem_limit,
        ),
    )(logits)

    # Shift, gather the label logit (tiny B*S gather vs. the V-wide stream),
    # mask ignore_index, and average -- all cheap plain-JAX ops.
    shift_labels = labels[:, 1:].astype(jnp.int32)                # (B, S-1)
    valid = shift_labels != ignore_index
    safe = jnp.where(valid, shift_labels, 0)
    idx_full = jnp.concatenate(
        [safe, jnp.zeros((B, 1), jnp.int32)], axis=1)[..., None]  # (B, S, 1)
    picked = jnp.take_along_axis(logits, idx_full, axis=-1)[:, :-1, 0]
    picked = picked.astype(jnp.float32)                           # (B, S-1)

    nll = jnp.where(valid, lse[:, :-1, 0] - picked, 0.0)
    count = jnp.sum(valid.astype(jnp.float32))
    # NOTE: if every shifted label is ignore_index this is 0/0 = NaN, matching torch.
    return jnp.sum(nll) / count


def _reference_loss(logits, labels, ignore_index=-100):
    V = logits.shape[-1]
    shift_logits = logits[:, :-1, :].reshape(-1, V).astype(jnp.float32)
    shift_labels = labels[:, 1:].reshape(-1)
    logp = jax.nn.log_softmax(shift_logits, axis=-1)
    valid = shift_labels != ignore_index
    safe = jnp.where(valid, shift_labels, 0)
    nll = -jnp.take_along_axis(logp, safe[:, None], axis=-1)[:, 0]
    nll = jnp.where(valid, nll, 0.0)
    return jnp.sum(nll) / jnp.sum(valid.astype(jnp.float32))


if __name__ == "__main__":
    key = jax.random.PRNGKey(0)

    def run_case(B, S, V, dtype=jnp.float32, tile_rows=None, tile_vocab=None, tol=1e-5):
        k1, k2, k3 = jax.random.split(key, 3)
        logits = jax.random.normal(k1, (B, S, V), dtype=jnp.float32).astype(dtype)
        labels = jax.random.randint(k2, (B, S), 0, V, dtype=jnp.int32)
        # Sprinkle ignore_index tokens to exercise the masking path.
        ignore_mask = jax.random.bernoulli(k3, 0.2, (B, S))
        labels = jnp.where(ignore_mask, jnp.int32(-100), labels)

        loss = jax.block_until_ready(
            shifted_cross_entropy(logits, labels, ignore_index=-100,
                                  tile_rows=tile_rows, tile_vocab=tile_vocab))
        ref = jax.block_until_ready(_reference_loss(logits, labels, ignore_index=-100))
        assert jnp.allclose(loss, ref, atol=tol, rtol=tol), (loss, ref)

    # Small default case (single seq tile, single vocab tile, auto tiling).
    run_case(2, 8, 128)
    # Multiple sequence tiles + the online-logsumexp vocab streaming path.
    run_case(2, 16, 384, tile_rows=8, tile_vocab=128)
    # Ragged last vocab tile (V % tv != 0) -> exercises the static mask path.
    run_case(2, 8, 320, tile_vocab=256)
    # bf16 logits: dtype-aware sublane granularity + in-kernel f32 accumulation.
    run_case(2, 16, 256, dtype=jnp.bfloat16, tol=1e-4)

    print("KERNEL_OK")
</pallas_src>

<mosaic_0001>
module attributes {stable_mosaic.version = 11 : i64} {
  func.func @_lse_kernel(%arg0: i32, %arg1: i32, %arg2: i32, %arg3: memref<1x8x128xf32, #tpu.memory_space<vmem>>, %arg4: memref<1x8x1xf32, #tpu.memory_space<vmem>>, %arg5: memref<1x8x1xf32, #tpu.memory_space<vmem>>, %arg6: memref<1x8x1xf32, #tpu.memory_space<vmem>>) attributes {dimension_semantics = [#tpu.dimension_semantics<parallel>, #tpu.dimension_semantics<parallel>, #tpu.dimension_semantics<arbitrary>], iteration_bounds = array<i64: 2, 1, 1>, scalar_prefetch = 0 : i64, scratch_operands = 2 : i64, tpu.core_type = #tpu.core_type<tc>, window_params = [{transform_indices = @transform_0, window_bounds = array<i64: 1, 8, 128>}, {transform_indices = @transform_1, window_bounds = array<i64: 1, 8, 1>}]} {
    %c0_i32 = arith.constant 0 : i32
    %0 = arith.cmpi eq, %arg2, %c0_i32 : i32
    %1 = arith.extui %0 : i1 to i32
    %c0_i32_0 = arith.constant 0 : i32
    %2 = arith.cmpi ne, %1, %c0_i32_0 : i32
    scf.if %2 {
      %cst_18 = arith.constant 0xFF800000 : f32
      %23 = vector.broadcast %cst_18 : f32 to vector<1x8x1xf32>
      %c0_19 = arith.constant 0 : index
      %c0_20 = arith.constant 0 : index
      %c0_21 = arith.constant 0 : index
      %24 = vector.load %arg5[%c0_19, %c0_20, %c0_21] : memref<1x8x1xf32, #tpu.memory_space<vmem>>, vector<1x8x1xf32>
      tpu.vector_store %arg5[%c0_19, %c0_20, %c0_21], %23 {strides = array<i32>} : memref<1x8x1xf32, #tpu.memory_space<vmem>>, vector<1x8x1xf32>,
      %cst_22 = arith.constant 0.000000e+00 : f32
      %25 = vector.broadcast %cst_22 : f32 to vector<1x8x1xf32>
      %c0_23 = arith.constant 0 : index
      %c0_24 = arith.constant 0 : index
      %c0_25 = arith.constant 0 : index
      %26 = vector.load %arg6[%c0_23, %c0_24, %c0_25] : memref<1x8x1xf32, #tpu.memory_space<vmem>>, vector<1x8x1xf32>
      tpu.vector_store %arg6[%c0_23, %c0_24, %c0_25], %25 {strides = array<i32>} : memref<1x8x1xf32, #tpu.memory_space<vmem>>, vector<1x8x1xf32>,
    } else {
    }
    %c0 = arith.constant 0 : index
    %c0_1 = arith.constant 0 : index
    %c0_2 = arith.constant 0 : index
    %3 = vector.load %arg3[%c0, %c0_1, %c0_2] : memref<1x8x128xf32, #tpu.memory_space<vmem>>, vector<1x8x128xf32>
    %c0_3 = arith.constant 0 : index
    %c0_4 = arith.constant 0 : index
    %c0_5 = arith.constant 0 : index
    %4 = vector.load %arg5[%c0_3, %c0_4, %c0_5] : memref<1x8x1xf32, #tpu.memory_space<vmem>>, vector<1x8x1xf32>
    %cst = arith.constant dense<0xFF800000> : vector<1x8xf32>
    %5 = vector.multi_reduction <maximumf>, %3, %cst [2] : vector<1x8x128xf32> to vector<1x8xf32>
    %6 = vector.shape_cast %5 : vector<1x8xf32> to vector<1x8x1xf32>
    %7 = arith.maximumf %4, %6 : vector<1x8x1xf32>
    %c0_6 = arith.constant 0 : index
    %c0_7 = arith.constant 0 : index
    %c0_8 = arith.constant 0 : index
    %8 = vector.load %arg6[%c0_6, %c0_7, %c0_8] : memref<1x8x1xf32, #tpu.memory_space<vmem>>, vector<1x8x1xf32>
    %9 = arith.subf %4, %7 : vector<1x8x1xf32>
    %10 = math.exp %9 : vector<1x8x1xf32>
    %11 = arith.mulf %8, %10 : vector<1x8x1xf32>
    %12 = vector.broadcast %7 : vector<1x8x1xf32> to vector<1x8x128xf32>
    %13 = arith.subf %3, %12 : vector<1x8x128xf32>
    %14 = math.exp %13 : vector<1x8x128xf32>
    %cst_9 = arith.constant dense<0.000000e+00> : vector<1x8xf32>
    %15 = vector.multi_reduction <add>, %14, %cst_9 [2] : vector<1x8x128xf32> to vector<1x8xf32>
    %16 = vector.shape_cast %15 : vector<1x8xf32> to vector<1x8x1xf32>
    %17 = arith.addf %11, %16 : vector<1x8x1xf32>
    %c0_10 = arith.constant 0 : index
    %c0_11 = arith.constant 0 : index
    %c0_12 = arith.constant 0 : index
    %18 = vector.load %arg6[%c0_10, %c0_11, %c0_12] : memref<1x8x1xf32, #tpu.memory_space<vmem>>, vector<1x8x1xf32>
    tpu.vector_store %arg6[%c0_10, %c0_11, %c0_12], %17 {strides = array<i32>} : memref<1x8x1xf32, #tpu.memory_space<vmem>>, vector<1x8x1xf32>,
    %c0_13 = arith.constant 0 : index
    %c0_14 = arith.constant 0 : index
    %c0_15 = arith.constant 0 : index
    %19 = vector.load %arg5[%c0_13, %c0_14, %c0_15] : memref<1x8x1xf32, #tpu.memory_space<vmem>>, vector<1x8x1xf32>
    tpu.vector_store %arg5[%c0_13, %c0_14, %c0_15], %7 {strides = array<i32>} : memref<1x8x1xf32, #tpu.memory_space<vmem>>, vector<1x8x1xf32>,
    %c0_i32_16 = arith.constant 0 : i32
    %20 = arith.cmpi eq, %arg2, %c0_i32_16 : i32
    %21 = arith.extui %20 : i1 to i32
    %c0_i32_17 = arith.constant 0 : i32
    %22 = arith.cmpi ne, %21, %c0_i32_17 : i32
    scf.if %22 {
      %c0_18 = arith.constant 0 : index
      %c0_19 = arith.constant 0 : index
      %c0_20 = arith.constant 0 : index
      %23 = vector.load %arg5[%c0_18, %c0_19, %c0_20] : memref<1x8x1xf32, #tpu.memory_space<vmem>>, vector<1x8x1xf32>
      %c0_21 = arith.constant 0 : index
      %c0_22 = arith.constant 0 : index
      %c0_23 = arith.constant 0 : index
      %24 = vector.load %arg6[%c0_21, %c0_22, %c0_23] : memref<1x8x1xf32, #tpu.memory_space<vmem>>, vector<1x8x1xf32>
      %25 = math.log %24 : vector<1x8x1xf32>
      %26 = arith.addf %23, %25 : vector<1x8x1xf32>
      %c0_24 = arith.constant 0 : index
      %c0_25 = arith.constant 0 : index
      %c0_26 = arith.constant 0 : index
      %27 = vector.load %arg4[%c0_24, %c0_25, %c0_26] : memref<1x8x1xf32, #tpu.memory_space<vmem>>, vector<1x8x1xf32>
      tpu.vector_store %arg4[%c0_24, %c0_25, %c0_26], %26 {strides = array<i32>} : memref<1x8x1xf32, #tpu.memory_space<vmem>>, vector<1x8x1xf32>,
    } else {
    }
    return
  }
  func.func @transform_0(%arg0: i32, %arg1: i32, %arg2: i32) -> (i32, i32, i32) {
    %c0_i32 = arith.constant 0 : i32
    return %arg0, %arg1, %arg2 : i32, i32, i32
  }
  func.func @transform_1(%arg0: i32, %arg1: i32, %arg2: i32) -> (i32, i32, i32) {
    %c0_i32 = arith.constant 0 : i32
    %c0_i32_0 = arith.constant 0 : i32
    return %arg0, %arg1, %c0_i32 : i32, i32, i32
  }
}

</mosaic_0001>

<bundles_post_ra>
// kernel: tpu_custom_call.1
= control target key start
LH: loop header
LB: loop body
LE: loop exit
PB: predicated region body
PF: predicated region fallthrough
CT: control target
= control target key end

     0   :  { %6 = vsyncpa [#allocation5], 0  ;;  %s595_s0 = inlined_call_operand.hbm [shape: f32[2,8,128], index: 0, kind: input, shape index: {}]   ;;  %s596_s1 = inlined_call_operand.vmem [shape: f32[2,8,1], index: 1, kind: output, shape index: {}]  }
   0x1   :  { %8 = vsyncpa [#allocation5 + $0x1], 0  ;;  %s465_s6 = smov 0   ;;  %s467_s7 = smov 0  }
   0x2   :  { %s469_s8 = smov 0   ;;  %s471_s9 = smov 0  }
   0x3   :  { %s473_s10 = smov 0   ;;  %s475_s11 = smov 0  }
   0x4 LB: > { %s293_s12 = sadd.s32 4294967295, %s449_s11   ;;  %s33_s13 = sadd.s32 1, %s445_s10  ;;  %s449_s11 = sphi %s475_s11, %s14_s11   ;;  %s445_s10 = sphi %s473_s10, %s606_s10   ;;  %s441_s9 = sphi %s471_s9, %s605_s9   ;;  %s437_s8 = sphi %s469_s8, %s604_s8   ;;  %s433_s7 = sphi %s467_s7, %s603_s7   ;;  %s429_s6 = sphi %s465_s6, %s602_s6  }
   0x5   : > { %p35_p0 = scmp.ge.s32.totalorder %s33_s13, 2  ;;  %s44_s14 = sadd.s32 1, %s437_s8 }
   0x6   : > { %p51_p1 = scmp.ne.s32.totalorder %s437_s8, %s433_s7  ;;  %p52_p2 = scmp.eq.s32.totalorder %s449_s11, 0 }
   0x7   : > { %s608_s13 = smov (%p35_p0, %s33_s13), 0  ;;  %p57_p4 = scmp.ne.s32.totalorder %s433_s7, %s429_s6 }
   0x8   : > { %p501_p3 = por %p52_p2, %p51_p1  ;;  %s37_s16 = ssub.s32 %s445_s10, %s608_s13 }
   0x9   : > { %p58_p5 = scmp.eq.s32.totalorder %s293_s12, 0  ;;  %p42_p6 = scmp.eq.s32.totalorder %s37_s16, 0 }
   0xa   : > { %p310_p8 = scmp.lt.s32.totalorder %s449_s11, 2  ;;  %s109_s19 = sand.u32 1, %s437_s8  }
   0xb   : > { %p508_p7 = por %p58_p5, %p57_p4  ;;  %s298_s20 = sshll.u32 %s445_s10, 7 }
   0xc   : > { %s514_s18 = scalar_select %p42_p6, %s437_s8, %s44_s14  }
   0xd   : > { %s297_s21 = sshll.u32 %s109_s19, 3  ;;  %s521_s24 = scalar_lea.hbm %s595_s0, %s298_s20 }
   0xe   : > { %s113_s25 = scalar_lea.vmem [#allocation4], %s297_s21  ;;  %p525_p9 = pnand %p310_p8, %p501_p3 }
   0xf   : > { %s122_s26 = sshll.u32 %s113_s25, 4  ;;  %s110_s28 = scalar_lea.sflag [#allocation5], %s109_s19  ;;  %s529_s26 = int_to_ptr.vmem [resolvable:$true] %s122_s26 }
  0x10   : > { %s369_s29 = scalar_lea.hbm %s521_s24, 128  ;;  %p371_p13 = pneg %p525_p9 }
  0x11   : > { %p370_p12 = scmp.ne.s32.totalorder %s521_s24, %s369_s29  ;;  %s374_s3 = scalar_lea.hbm %s595_s0, 256 }
  0x12   : > { %p375_p2 = scmp.lt.u32.totalorder %s521_s24, %s595_s0  ;;  %p376_p3 = scmp.lt.u32.totalorder %s374_s3, %s369_s29 }
  0x13   : > { %p372_p0 = pnand %p371_p13, %p370_p12  ;;  %p378_p5 = scmp.lt.u32.totalorder %s369_s29, %s521_s24 }
  0x14   : > { %p377_p4 = por %p376_p3, %p375_p2 }
  0x15   : > { %p373_p1 = pneg %p372_p0 }
  0x16   : > { %p379_p6 = por %p378_p5, %p377_p4 }
  0x18   : > { %p380_p8 = pnand %p379_p6, %p373_p1 }
  0x1a   : > { %383 = shalt.err (!%p380_p8)
}
  0x1b   : > { %s384_s6 = scalar_lea.vmem %s529_s26, 128  ;;  %s451_s12 = smov [#allocation4]  }
  0x1c   : > { %p385_p12 = scmp.ne.s32.totalorder %s529_s26, %s384_s6  ;;  %s389_s14 = sshll.u32 %s451_s12, 4  ;;  %s390_s14 = int_to_ptr.vmem [resolvable:$false] %s389_s14 }
  0x1d   : > { %s391_s15 = scalar_lea.vmem %s390_s14, 256  ;;  %p392_p11 = scmp.lt.s32.totalorder %s529_s26, %s390_s14 }
  0x1e   : > { %p387_p0 = pnand %p385_p12, %p371_p13  ;;  %p393_p2 = scmp.lt.s32.totalorder %s391_s15, %s384_s6 }
  0x20   : > { %p388_p10 = pneg %p387_p0  ;;  %p394_p3 = por %p393_p2, %p392_p11 }
  0x22   : > { %p395_p4 = pnand %p394_p3, %p388_p10 }
  0x24   : > { %398 = shalt.err (!%p395_p4)
}
  0x25   : > { %309 = dma.hbm_to_vmem [thread:$0]  (!%p525_p9), %s521_s24, 128, %s529_s26, %s110_s28  }
  0x26   : > { %p600_p1 = scmp.lt.s32.totalorder %s449_s11, 3  ;;  %p601_p5 = scmp.ge.s32.totalorder %s449_s11, 1 }
  0x28   : > { %p128_p13 = pnand %p601_p5, %p600_p1 }
  0x29   : > { %s133_s16 = sand.u32 (!%p128_p13), 1, %s433_s7  }
  0x2a   : > { %131 = sbr.rel (%p128_p13) target bundleno = 506 (0x1fa), region = 24  ;;  %s300_s19 = sshll.u32 (!%p128_p13), %s133_s16, 3 }
  0x2b   : > { %s134_s20 = scalar_lea.sflag (!%p128_p13), [#allocation5], %s133_s16  ;;  %s137_s21 = scalar_lea.vmem (!%p128_p13), [#allocation4], %s300_s19 }
  0x31   : > { %424 = dma.done.wait (%p508_p7), %s134_s20, 128  }
  0x32   : > { %426 = vsyncadd (%p508_p7), %s134_s20, 4294967168  ;;  %vm169_vm0 = vcmask 7168   ;;  %v452_v0 = vmov -inf   ;;  %v172_v1 = vld [vmem:[%s137_s21] sm:$0xff]  ;;  %v453_v2 = vmov 0   ;;  %v454_v3 = vmov 0.0  }
  0x33   : > { %170 = vst.msk [vmem:[#allocation2] sm:$0xff] %vm169_vm0, %v452_v0  ;;  %174 = vmax.xlane.f32.xlu0 %v172_v1  ;;  %171 = vst.msk [vmem:[#allocation3] sm:$0xff] %vm169_vm0, %v454_v3  ;;  %p158_p7 = scmp.lt.s32.totalorder %s441_s9, 1 }
  0x34   : > { %362 = vset.pattern.permute.xlu0 %v453_v2 }
  0x35   : > { %s610_s9 = smov (!%p158_p7, %s441_s9), 1 }
  0x36   : > { %s301_s17 = sshll.u32 %s610_s9, 3 }
  0x37   : > { %s164_s24 = scalar_lea.vmem %s596_s1, %s301_s17 }
  0x3a   : > { %v173_v4 = vld [vmem:[#allocation2] sm:$0xff]  ;;  %v177_v14 = vld [vmem:[#allocation3] sm:$0xff] }
  0xc0   : > { %v175_v5 = vpop.xlane.xlu0 %174 }
  0xc1   : > { %v176_v6 = vmax.f32 %v173_v4, %v175_v5 }
  0xc3   : > { %v178_v7 = vsub.f32 %v173_v4, %v176_v6  ;;  %195 = vst.msk [vmem:[#allocation2] sm:$0xff] %vm169_vm0, %v176_v6  ;;  %184 = vperm.xlu0 %362, %v176_v6  }
  0xc5   : > { %v179_v12 = vmul.f32 1.442695, %v178_v7 }
  0xca   : > { %v199_v21 = vld [vmem:[#allocation2] sm:$0xff] }
 0x142   : > { %v185_v8 = vpop.permute.xlu0 %184 }
 0x143   : > { %v187_v9 = vsub.f32 %v172_v1, %v185_v8 }
 0x145   : > { %v188_v10 = vmul.f32 1.442695, %v187_v9 }
 0x147   : > { %363 = vpow2.f32 %v188_v10 }
 0x148   : > { %365 = vpow2.f32 %v179_v12 }
 0x151   : > { %v364_v11 = vpop.eup %363 }
 0x152   : > { %190 = vadd.xlane.f32.xlu1 %v364_v11  ;;  %v366_v13 = vpop.eup %365 }
 0x153   : > { %v181_v15 = vmul.f32 %v366_v13, %v177_v14 }
 0x1df   : > { %v191_v16 = vpop.xlane.xlu1 %190 }
 0x1e0   : > { %v192_v17 = vadd.f32 %v191_v16, %v181_v15 }
 0x1e2   : > { %194 = vst.msk [vmem:[#allocation3] sm:$0xff] %vm169_vm0, %v192_v17 }
 0x1e9   : > { %v200_v18 = vld [vmem:[#allocation3] sm:$0xff] }
 0x1ea   : > { %367 = vlog2.f32 %v200_v18 }
 0x1f4   : > { %v368_v19 = vpop.eup %367 }
 0x1f5   : > { %v202_v20 = vmul.f32 0.6931472, %v368_v19 }
 0x1f7   : > { %v203_v22 = vadd.f32 %v202_v20, %v199_v21 }
 0x1f9   : > { %204 = vst.msk [vmem:[%s164_s24] sm:$0xff] %vm169_vm0, %v203_v22 }
 0x1fa PF: > { %s14_s11 = sadd.s32 1, %s449_s11   ;;  %s602_s6 = smov %s433_s7 }
 0x1fb   : > { %p11_p9 = scmp.ge.s32.totalorder %s14_s11, 4   ;;  %s603_s7 = smov %s437_s8 }
 0x1fc   : > { %s604_s8 = smov %s514_s18  ;;  %s605_s9 = smov %s445_s10 }
 0x1fd   : > { %s606_s10 = smov %s608_s13  ;;  %13 = sbr.rel (!%p11_p9) target bundleno = 4 (0x4), region = 72 }
 0x204   :  { %230 = vsyncpa [#allocation5], 1 }
 0x205   :  { %232 = vsyncpa [#allocation5 + $0x1], 1 }

</bundles_post_ra>
